<compile_context>
chip_gen: v6e
topology: v6e:2x2x1
jax: 0.10.0
libtpu: 0.0.40
codegen_flags: <defaults>
</compile_context>

<pallas_src>
import functools

import jax
import jax.numpy as jnp
from jax.experimental import pallas as pl
from jax.experimental.pallas import tpu as pltpu


def _focal_loss_kernel(alpha_ref, x_ref, tgt_ref, out_ref, *,
                       gamma, smooth, hw, s_tile, lw, fuse_softmax, needs_mask):
    """One grid step: focal loss over a dense (S_TILE, LW) slab of positions."""
    num_class = x_ref.shape[1]
    tgt = tgt_ref[0]                                   # (S_TILE, LW) integer labels

    # smoothed one-hot values (clip of {0,1} onto [lo, hi]) as Python constants
    if smooth:
        hi = 1.0 - smooth
        # TODO(synk): num_class == 1 with smooth > 0 divides by zero here, same
        # as the torch reference.
        lo = smooth / (num_class - 1)
    else:
        hi, lo = 1.0, 0.0

    if fuse_softmax:
        # numerically-stable softmax over the class axis, fused in-kernel.
        # Per-class unrolled loop: each x_ref[0, c] is a dense (S_TILE, LW)
        # slab, so the "class reductions" are plain elementwise VPU ops.
        m = x_ref[0, 0].astype(jnp.float32)
        for c in range(1, num_class):
            m = jnp.maximum(m, x_ref[0, c].astype(jnp.float32))
        denom = jnp.zeros_like(m)
        num = jnp.zeros_like(m)
        alpha_row = jnp.zeros_like(m)
        for c in range(num_class):
            e = jnp.exp(x_ref[0, c].astype(jnp.float32) - m)      # EUP
            denom = denom + e
            is_c = tgt == c
            num = num + jnp.where(is_c, hi, lo) * e               # sum_c(oh*e)
            alpha_row = jnp.where(is_c, alpha_ref[c], alpha_row)  # alpha[target]
        # one reciprocal per position, on the EUP slot.
        pt = num * pl.reciprocal(denom, approx=True) + smooth
    else:
        num = jnp.zeros((s_tile, lw), jnp.float32)
        alpha_row = jnp.zeros((s_tile, lw), jnp.float32)
        for c in range(num_class):
            xc = x_ref[0, c].astype(jnp.float32)
            is_c = tgt == c
            num = num + jnp.where(is_c, hi, lo) * xc
            alpha_row = jnp.where(is_c, alpha_ref[c], alpha_row)
        pt = num + smooth

    logpt = jnp.log(pt)
    one_minus = 1.0 - pt
    if float(gamma) == int(gamma):
        focal = jax.lax.integer_pow(one_minus, int(gamma))
    else:
        focal = jnp.power(one_minus, gamma)
    loss = -(alpha_row * focal) * logpt                 # dense (S_TILE, LW)

    # mask padded / overshoot positions (statically compiled out when the
    # tiling covers HW exactly).  Applied after all arithmetic, before reduce.
    if needs_mask:
        j = pl.program_id(1)
        row = jax.lax.broadcasted_iota(jnp.int32, loss.shape, 0)
        lane = jax.lax.broadcasted_iota(jnp.int32, loss.shape, 1)
        pos = (j * s_tile + row) * lw + lane
        loss = jnp.where(pos < hw, loss, 0.0)

    # per-step partial sum; every grid step is independent (megacore-friendly).
    out_ref[...] = jnp.sum(loss).reshape(1, 1, 1, 1)


def _build_alpha(alpha, num_class, balance_index):
    """Replicates the torch module's alpha preprocessing; returns (C,) f32."""
    if alpha is None:
        alpha_vec = jnp.ones((num_class,), jnp.float32)
    elif isinstance(alpha, (list, tuple)) or hasattr(alpha, "shape"):
        a = jnp.asarray(alpha, jnp.float32).reshape(num_class)
        alpha_vec = a / a.sum()
    elif isinstance(alpha, float):
        a = jnp.ones((num_class,), jnp.float32) * (1.0 - alpha)
        alpha_vec = a.at[balance_index].set(alpha)
    else:
        raise TypeError("Not support alpha type")
    return alpha_vec


def focal_loss(logit, target, *, apply_nonlin=None, alpha=None, gamma=2.0,
               balance_index=0, smooth=1e-5, size_average=True,
               tile_positions=65536, lane_width=512, vmem_limit_bytes=None):
    """Pallas-backed FocalLoss.forward.

    `logit`: (N, C, ...spatial) or (M, C), f32 or bf16.  `target`: matching
    integer labels (any integer dtype; narrow ints are consumed as-is).
    `apply_nonlin`: None, the string "softmax" (class-dim softmax fused inside
    the kernel -- the fast path), or an arbitrary callable (applied outside
    the kernel, costing one extra HBM pass).
    """
    if smooth is not None and (smooth < 0 or smooth > 1.0):
        raise ValueError("smooth value should be in [0,1]")

    fuse_softmax = isinstance(apply_nonlin, str) and apply_nonlin == "softmax"
    if apply_nonlin is not None and not fuse_softmax:
        # TODO(synk): arbitrary callables cannot be fused into the kernel.
        logit = apply_nonlin(logit)

    num_class = logit.shape[1]
    if logit.ndim > 2:
        n = logit.shape[0]
        x = logit.reshape(n, num_class, -1)        # free view: NCHW -> (N, C, HW)
    else:
        # TODO(synk): the class-last (M, C) path still pays one transpose HBM
        # pass; a dedicated class-last kernel would avoid it.
        n = 1
        x = jnp.transpose(logit, (1, 0)).reshape(1, num_class, -1)
    hw = x.shape[-1]
    m_rows = n * hw

    if not jnp.issubdtype(target.dtype, jnp.integer):
        target = target.astype(jnp.int32)
    tgt = target.reshape(n, hw)

    # pad the spatial axis to a multiple of 128 lanes (masked inside the kernel)
    hw_pad = ((hw + 127) // 128) * 128
    if hw_pad != hw:
        x = jnp.pad(x, ((0, 0), (0, 0), (0, hw_pad - hw)))
        tgt = jnp.pad(tgt, ((0, 0), (0, hw_pad - hw)))

    # lane width: largest multiple of 128 (<= lane_width) dividing hw_pad
    lw = max(128, (int(lane_width) // 128) * 128)
    while hw_pad % lw != 0:
        lw -= 128
    s_total = hw_pad // lw

    # sublane tile: ~tile_positions positions per grid step; multiple of 32 so
    # bf16 / int8 blocks stay layout-legal, or the full dim.
    s_desired = max(32, int(tile_positions) // lw)
    if s_total <= s_desired:
        s_tile = s_total
    else:
        s_tile = min(s_total, max(32, (s_desired // 32) * 32))
    num_s_tiles = pl.cdiv(s_total, s_tile)

    x4 = x.reshape(n, num_class, s_total, lw)        # free view
    tgt3 = tgt.reshape(n, s_total, lw)               # free view
    alpha_vec = _build_alpha(alpha, num_class, balance_index)   # (C,) -> SMEM

    needs_mask = (num_s_tiles * s_tile * lw) != hw
    smooth_val = 0.0 if smooth is None else float(smooth)

    if vmem_limit_bytes is None:
        step_in = (num_class * x4.dtype.itemsize + tgt3.dtype.itemsize) * s_tile * lw
        computed = 2 * step_in + 16 * 4 * s_tile * lw + (4 << 20)
        # cap at 48 MiB so the same config fits v7x's 64 MiB physical VMEM.
        vmem_limit_bytes = min(48 << 20, max(32 << 20, computed))

    kernel = functools.partial(
        _focal_loss_kernel,
        gamma=float(gamma), smooth=smooth_val, hw=hw,
        s_tile=s_tile, lw=lw, fuse_softmax=fuse_softmax, needs_mask=needs_mask)

    partials = pl.pallas_call(
        kernel,
        out_shape=jax.ShapeDtypeStruct((n, num_s_tiles, 1, 1), jnp.float32),
        grid_spec=pltpu.PrefetchScalarGridSpec(
            num_scalar_prefetch=0,
            grid=(n, num_s_tiles),
            in_specs=[
                pl.BlockSpec(memory_space=pltpu.MemorySpace.SMEM),   # alpha (C,)
                pl.BlockSpec((1, num_class, s_tile, lw), lambda b, j: (b, 0, j, 0)),
                pl.BlockSpec((1, s_tile, lw), lambda b, j: (b, j, 0)),
            ],
            out_specs=pl.BlockSpec((1, 1, 1, 1), lambda b, j: (b, j, 0, 0)),
        ),
        compiler_params=pltpu.CompilerParams(
            dimension_semantics=("parallel", "parallel"),
            vmem_limit_bytes=int(vmem_limit_bytes),
        ),
    )(alpha_vec, x4, tgt3)

    # tiny (N * num_tiles)-element reduce in JAX; also combines the two
    # TensorCore partials on v7x.
    denom_div = float(m_rows) if size_average else 1.0
    return jnp.sum(partials) / denom_div


def focal_loss_ref(logit, target, *, apply_nonlin=None, alpha=None, gamma=2.0,
                   balance_index=0, smooth=1e-5, size_average=True):
    """Pure-JAX reference matching the torch module exactly."""
    if apply_nonlin is not None:
        if isinstance(apply_nonlin, str) and apply_nonlin == "softmax":
            logit = jax.nn.softmax(logit.astype(jnp.float32), axis=1)
        else:
            logit = apply_nonlin(logit)
    num_class = logit.shape[1]
    if logit.ndim > 2:
        nb = logit.shape[0]
        x = jnp.transpose(logit.reshape(nb, num_class, -1), (0, 2, 1))
        x = x.reshape(-1, num_class)
    else:
        x = logit
    x = x.astype(jnp.float32)
    tgt = target.reshape(-1).astype(jnp.int32)
    alpha_vec = _build_alpha(alpha, num_class, balance_index)

    one_hot = jax.nn.one_hot(tgt, num_class, dtype=jnp.float32)
    if smooth:
        one_hot = jnp.clip(one_hot, smooth / (num_class - 1), 1.0 - smooth)
    pt = jnp.sum(one_hot * x, axis=1) + smooth
    logpt = jnp.log(pt)
    a = alpha_vec[tgt]
    loss = -a * jnp.power(1.0 - pt, gamma) * logpt
    return jnp.mean(loss) if size_average else jnp.sum(loss)


if __name__ == "__main__":
    key = jax.random.PRNGKey(0)
    k1, k2 = jax.random.split(key)

    N, C, H, W = 2, 4, 16, 16
    logits_nchw = jax.random.normal(k1, (N, C, H, W), dtype=jnp.float32)
    target = jax.random.randint(k2, (N, H, W), 0, C, dtype=jnp.int32)

    # Fast path: softmax over the class dim fused into the kernel.
    loss = focal_loss(logits_nchw, target, apply_nonlin="softmax")
    loss = jax.block_until_ready(loss)
    ref = focal_loss_ref(logits_nchw, target, apply_nonlin="softmax")
    assert jnp.isfinite(loss), "kernel produced non-finite loss"
    assert jnp.allclose(loss, ref, rtol=1e-3, atol=1e-5), (loss, ref)

    # Per-class alpha list, gamma=3, sum reduction.
    alpha_list = [0.1, 0.4, 0.3, 0.2]
    loss2 = focal_loss(logits_nchw, target, apply_nonlin="softmax",
                       alpha=alpha_list, gamma=3.0, size_average=False)
    loss2 = jax.block_until_ready(loss2)
    ref2 = focal_loss_ref(logits_nchw, target, apply_nonlin="softmax",
                          alpha=alpha_list, gamma=3.0, size_average=False)
    assert jnp.isfinite(loss2), "kernel produced non-finite loss (case 2)"
    assert jnp.allclose(loss2, ref2, rtol=1e-3, atol=1e-5), (loss2, ref2)

    print("KERNEL_OK")
</pallas_src>

<mosaic_0001>
module attributes {stable_mosaic.version = 11 : i64} {
  func.func @_focal_loss_kernel(%arg0: i32, %arg1: i32, %arg2: memref<4xf32, #tpu.memory_space<smem>>, %arg3: memref<1x4x1x256xf32, #tpu.memory_space<vmem>>, %arg4: memref<1x1x256xi32, #tpu.memory_space<vmem>>, %arg5: memref<1x1x1x1xf32, #tpu.memory_space<vmem>>) attributes {dimension_semantics = [#tpu.dimension_semantics<parallel>, #tpu.dimension_semantics<parallel>], iteration_bounds = array<i64: 2, 1>, scalar_prefetch = 0 : i64, scratch_operands = 0 : i64, tpu.core_type = #tpu.core_type<tc>, window_params = [{transform_indices = @transform_0, window_bounds = array<i64: 4>}, {transform_indices = @transform_1, window_bounds = array<i64: 1, 4, 1, 256>}, {transform_indices = @transform_2, window_bounds = array<i64: 1, 1, 256>}, {transform_indices = @transform_3, window_bounds = array<i64: 1, 1, 1, 1>}]} {
    %c0 = arith.constant 0 : index
    %c0_0 = arith.constant 0 : index
    %c0_1 = arith.constant 0 : index
    %0 = vector.load %arg4[%c0, %c0_0, %c0_1] : memref<1x1x256xi32, #tpu.memory_space<vmem>>, vector<1x1x256xi32>
    %1 = vector.shape_cast %0 : vector<1x1x256xi32> to vector<1x256xi32>
    %c0_2 = arith.constant 0 : index
    %c0_3 = arith.constant 0 : index
    %c0_4 = arith.constant 0 : index
    %c0_5 = arith.constant 0 : index
    %2 = vector.load %arg3[%c0_2, %c0_3, %c0_4, %c0_5] : memref<1x4x1x256xf32, #tpu.memory_space<vmem>>, vector<1x1x1x256xf32>
    %3 = vector.shape_cast %2 : vector<1x1x1x256xf32> to vector<1x256xf32>
    %c0_6 = arith.constant 0 : index
    %c1 = arith.constant 1 : index
    %c0_7 = arith.constant 0 : index
    %c0_8 = arith.constant 0 : index
    %4 = vector.load %arg3[%c0_6, %c1, %c0_7, %c0_8] : memref<1x4x1x256xf32, #tpu.memory_space<vmem>>, vector<1x1x1x256xf32>
    %5 = vector.shape_cast %4 : vector<1x1x1x256xf32> to vector<1x256xf32>
    %6 = arith.maximumf %3, %5 : vector<1x256xf32>
    %c0_9 = arith.constant 0 : index
    %c2 = arith.constant 2 : index
    %c0_10 = arith.constant 0 : index
    %c0_11 = arith.constant 0 : index
    %7 = vector.load %arg3[%c0_9, %c2, %c0_10, %c0_11] : memref<1x4x1x256xf32, #tpu.memory_space<vmem>>, vector<1x1x1x256xf32>
    %8 = vector.shape_cast %7 : vector<1x1x1x256xf32> to vector<1x256xf32>
    %9 = arith.maximumf %6, %8 : vector<1x256xf32>
    %c0_12 = arith.constant 0 : index
    %c3 = arith.constant 3 : index
    %c0_13 = arith.constant 0 : index
    %c0_14 = arith.constant 0 : index
    %10 = vector.load %arg3[%c0_12, %c3, %c0_13, %c0_14] : memref<1x4x1x256xf32, #tpu.memory_space<vmem>>, vector<1x1x1x256xf32>
    %11 = vector.shape_cast %10 : vector<1x1x1x256xf32> to vector<1x256xf32>
    %12 = arith.maximumf %9, %11 : vector<1x256xf32>
    %cst = arith.constant 0.000000e+00 : f32
    %13 = vector.broadcast %cst : f32 to vector<1x256xf32>
    %cst_15 = arith.constant 0.000000e+00 : f32
    %14 = vector.broadcast %cst_15 : f32 to vector<1x256xf32>
    %cst_16 = arith.constant 0.000000e+00 : f32
    %15 = vector.broadcast %cst_16 : f32 to vector<1x256xf32>
    %c0_17 = arith.constant 0 : index
    %c0_18 = arith.constant 0 : index
    %c0_19 = arith.constant 0 : index
    %c0_20 = arith.constant 0 : index
    %16 = vector.load %arg3[%c0_17, %c0_18, %c0_19, %c0_20] : memref<1x4x1x256xf32, #tpu.memory_space<vmem>>, vector<1x1x1x256xf32>
    %17 = vector.shape_cast %16 : vector<1x1x1x256xf32> to vector<1x256xf32>
    %18 = arith.subf %17, %12 : vector<1x256xf32>
    %19 = math.exp %18 : vector<1x256xf32>
    %20 = arith.addf %13, %19 : vector<1x256xf32>
    %c0_i32 = arith.constant 0 : i32
    %21 = vector.broadcast %c0_i32 : i32 to vector<1x256xi32>
    %22 = arith.cmpi eq, %1, %21 : vector<1x256xi32>
    %cst_21 = arith.constant 0.999989986 : f32
    %cst_22 = arith.constant 3.33333332E-6 : f32
    %23 = vector.broadcast %cst_21 : f32 to vector<1x256xf32>
    %24 = vector.broadcast %cst_22 : f32 to vector<1x256xf32>
    %25 = arith.select %22, %23, %24 : vector<1x256xi1>, vector<1x256xf32>
    %26 = arith.mulf %25, %19 : vector<1x256xf32>
    %27 = arith.addf %14, %26 : vector<1x256xf32>
    %c0_23 = arith.constant 0 : index
    %28 = memref.load %arg2[%c0_23] : memref<4xf32, #tpu.memory_space<smem>>
    %29 = vector.broadcast %28 : f32 to vector<1x256xf32>
    %30 = arith.select %22, %29, %15 : vector<1x256xi1>, vector<1x256xf32>
    %c0_24 = arith.constant 0 : index
    %c1_25 = arith.constant 1 : index
    %c0_26 = arith.constant 0 : index
    %c0_27 = arith.constant 0 : index
    %31 = vector.load %arg3[%c0_24, %c1_25, %c0_26, %c0_27] : memref<1x4x1x256xf32, #tpu.memory_space<vmem>>, vector<1x1x1x256xf32>
    %32 = vector.shape_cast %31 : vector<1x1x1x256xf32> to vector<1x256xf32>
    %33 = arith.subf %32, %12 : vector<1x256xf32>
    %34 = math.exp %33 : vector<1x256xf32>
    %35 = arith.addf %20, %34 : vector<1x256xf32>
    %c1_i32 = arith.constant 1 : i32
    %36 = vector.broadcast %c1_i32 : i32 to vector<1x256xi32>
    %37 = arith.cmpi eq, %1, %36 : vector<1x256xi32>
    %cst_28 = arith.constant 0.999989986 : f32
    %cst_29 = arith.constant 3.33333332E-6 : f32
    %38 = vector.broadcast %cst_28 : f32 to vector<1x256xf32>
    %39 = vector.broadcast %cst_29 : f32 to vector<1x256xf32>
    %40 = arith.select %37, %38, %39 : vector<1x256xi1>, vector<1x256xf32>
    %41 = arith.mulf %40, %34 : vector<1x256xf32>
    %42 = arith.addf %27, %41 : vector<1x256xf32>
    %c1_30 = arith.constant 1 : index
    %43 = memref.load %arg2[%c1_30] : memref<4xf32, #tpu.memory_space<smem>>
    %44 = vector.broadcast %43 : f32 to vector<1x256xf32>
    %45 = arith.select %37, %44, %30 : vector<1x256xi1>, vector<1x256xf32>
    %c0_31 = arith.constant 0 : index
    %c2_32 = arith.constant 2 : index
    %c0_33 = arith.constant 0 : index
    %c0_34 = arith.constant 0 : index
    %46 = vector.load %arg3[%c0_31, %c2_32, %c0_33, %c0_34] : memref<1x4x1x256xf32, #tpu.memory_space<vmem>>, vector<1x1x1x256xf32>
    %47 = vector.shape_cast %46 : vector<1x1x1x256xf32> to vector<1x256xf32>
    %48 = arith.subf %47, %12 : vector<1x256xf32>
    %49 = math.exp %48 : vector<1x256xf32>
    %50 = arith.addf %35, %49 : vector<1x256xf32>
    %c2_i32 = arith.constant 2 : i32
    %51 = vector.broadcast %c2_i32 : i32 to vector<1x256xi32>
    %52 = arith.cmpi eq, %1, %51 : vector<1x256xi32>
    %cst_35 = arith.constant 0.999989986 : f32
    %cst_36 = arith.constant 3.33333332E-6 : f32
    %53 = vector.broadcast %cst_35 : f32 to vector<1x256xf32>
    %54 = vector.broadcast %cst_36 : f32 to vector<1x256xf32>
    %55 = arith.select %52, %53, %54 : vector<1x256xi1>, vector<1x256xf32>
    %56 = arith.mulf %55, %49 : vector<1x256xf32>
    %57 = arith.addf %42, %56 : vector<1x256xf32>
    %c2_37 = arith.constant 2 : index
    %58 = memref.load %arg2[%c2_37] : memref<4xf32, #tpu.memory_space<smem>>
    %59 = vector.broadcast %58 : f32 to vector<1x256xf32>
    %60 = arith.select %52, %59, %45 : vector<1x256xi1>, vector<1x256xf32>
    %c0_38 = arith.constant 0 : index
    %c3_39 = arith.constant 3 : index
    %c0_40 = arith.constant 0 : index
    %c0_41 = arith.constant 0 : index
    %61 = vector.load %arg3[%c0_38, %c3_39, %c0_40, %c0_41] : memref<1x4x1x256xf32, #tpu.memory_space<vmem>>, vector<1x1x1x256xf32>
    %62 = vector.shape_cast %61 : vector<1x1x1x256xf32> to vector<1x256xf32>
    %63 = arith.subf %62, %12 : vector<1x256xf32>
    %64 = math.exp %63 : vector<1x256xf32>
    %65 = arith.addf %50, %64 : vector<1x256xf32>
    %c3_i32 = arith.constant 3 : i32
    %66 = vector.broadcast %c3_i32 : i32 to vector<1x256xi32>
    %67 = arith.cmpi eq, %1, %66 : vector<1x256xi32>
    %cst_42 = arith.constant 0.999989986 : f32
    %cst_43 = arith.constant 3.33333332E-6 : f32
    %68 = vector.broadcast %cst_42 : f32 to vector<1x256xf32>
    %69 = vector.broadcast %cst_43 : f32 to vector<1x256xf32>
    %70 = arith.select %67, %68, %69 : vector<1x256xi1>, vector<1x256xf32>
    %71 = arith.mulf %70, %64 : vector<1x256xf32>
    %72 = arith.addf %57, %71 : vector<1x256xf32>
    %c3_44 = arith.constant 3 : index
    %73 = memref.load %arg2[%c3_44] : memref<4xf32, #tpu.memory_space<smem>>
    %74 = vector.broadcast %73 : f32 to vector<1x256xf32>
    %75 = arith.select %67, %74, %60 : vector<1x256xi1>, vector<1x256xf32>
    %76 = tpu.reciprocal %65 {approx = true} : vector<1x256xf32> -> vector<1x256xf32>
    %77 = arith.mulf %72, %76 : vector<1x256xf32>
    %cst_45 = arith.constant 9.99999974E-6 : f32
    %78 = vector.broadcast %cst_45 : f32 to vector<1x256xf32>
    %79 = arith.addf %77, %78 : vector<1x256xf32>
    %80 = math.log %79 : vector<1x256xf32>
    %cst_46 = arith.constant 1.000000e+00 : f32
    %81 = vector.broadcast %cst_46 : f32 to vector<1x256xf32>
    %82 = arith.subf %81, %79 : vector<1x256xf32>
    %83 = arith.mulf %82, %82 : vector<1x256xf32>
    %84 = arith.mulf %75, %83 : vector<1x256xf32>
    %cst_47 = arith.constant 0.000000e+00 : f32
    %85 = vector.broadcast %cst_47 : f32 to vector<1x256xf32>
    %86 = arith.subf %85, %84 : vector<1x256xf32>
    %87 = arith.mulf %86, %80 : vector<1x256xf32>
    %88 = vector.shape_cast %87 : vector<1x256xf32> to vector<1x1x256xf32>
    %cst_48 = arith.constant dense<0.000000e+00> : vector<1xf32>
    %89 = vector.multi_reduction <add>, %88, %cst_48 [1, 2] : vector<1x1x256xf32> to vector<1xf32>
    %90 = vector.shape_cast %89 : vector<1xf32> to vector<1x1x1xf32>
    %91 = vector.extract %90[0, 0, 0] : f32 from vector<1x1x1xf32>
    %92 = vector.broadcast %91 : f32 to vector<1x1x1x1xf32>
    %c0_49 = arith.constant 0 : index
    %c0_50 = arith.constant 0 : index
    %c0_51 = arith.constant 0 : index
    %c0_52 = arith.constant 0 : index
    %93 = vector.load %arg5[%c0_49, %c0_50, %c0_51, %c0_52] : memref<1x1x1x1xf32, #tpu.memory_space<vmem>>, vector<1x1x1x1xf32>
    tpu.vector_store %arg5[%c0_49, %c0_50, %c0_51, %c0_52], %92 {strides = array<i32>} : memref<1x1x1x1xf32, #tpu.memory_space<vmem>>, vector<1x1x1x1xf32>,
    return
  }
  func.func @transform_0(%arg0: i32, %arg1: i32) -> i32 {
    %c0_i32 = arith.constant 0 : i32
    %c0_i32_0 = arith.constant 0 : i32
    return %c0_i32 : i32
  }
  func.func @transform_1(%arg0: i32, %arg1: i32) -> (i32, i32, i32, i32) {
    %c0_i32 = arith.constant 0 : i32
    %c0_i32_0 = arith.constant 0 : i32
    %c0_i32_1 = arith.constant 0 : i32
    return %arg0, %c0_i32, %arg1, %c0_i32_0 : i32, i32, i32, i32
  }
  func.func @transform_2(%arg0: i32, %arg1: i32) -> (i32, i32, i32) {
    %c0_i32 = arith.constant 0 : i32
    %c0_i32_0 = arith.constant 0 : i32
    return %arg0, %arg1, %c0_i32 : i32, i32, i32
  }
  func.func @transform_3(%arg0: i32, %arg1: i32) -> (i32, i32, i32, i32) {
    %c0_i32 = arith.constant 0 : i32
    %c0_i32_0 = arith.constant 0 : i32
    %c0_i32_1 = arith.constant 0 : i32
    return %arg0, %arg1, %c0_i32, %c0_i32_0 : i32, i32, i32, i32
  }
}

</mosaic_0001>

<bundles_post_ra>
// kernel: tpu_custom_call.1
= control target key start
LH: loop header
LB: loop body
LE: loop exit
PB: predicated region body
PF: predicated region fallthrough
CT: control target
= control target key end

     0   :  { %s884_s0 = inlined_call_operand.hbm [shape: f32[4], index: 0, kind: input, shape index: {}]   ;;  %s885_s1 = inlined_call_operand.hbm [shape: f32[2,4,1,256], index: 1, kind: input, shape index: {}]   ;;  %s886_s2 = inlined_call_operand.hbm [shape: s32[2,1,256], index: 2, kind: input, shape index: {}]   ;;  %s887_s3 = inlined_call_operand.vmem [shape: f32[2,1,1,1], index: 3, kind: output, shape index: {}]  }
   0x1   :  { %888 = sst [smem:[#allocation11_spill]] %s884_s0 }
   0x2   :  { %8 = vsyncpa [#allocation4], 0 }
   0x3   :  { %9 = vsyncpa [#allocation3], 0 }
   0x4   :  { %11 = vsyncpa [#allocation3 + $0x1], 0 }
   0x5   :  { %12 = vsyncpa [#allocation7], 0 }
   0x6   :  { %14 = vsyncpa [#allocation7 + $0x1], 0  ;;  %s741_s12 = smov 0   ;;  %s743_s13 = smov 0  }
   0x7   :  { %s745_s14 = smov 0   ;;  %s747_s15 = smov 0  }
   0x8   :  { %s749_s16 = smov 0   ;;  %s751_s17 = smov 0  }
   0x9 LB: > { %s475_s18 = sadd.s32 4294967295, %s713_s17   ;;  %s62_s19 = sadd.s32 1, %s701_s14  ;;  %s713_s17 = sphi %s751_s17, %s20_s17   ;;  %s709_s16 = sphi %s749_s16, %s898_s16   ;;  %s705_s15 = sphi %s747_s15, %s897_s15   ;;  %s701_s14 = sphi %s745_s14, %s896_s14   ;;  %s697_s13 = sphi %s743_s13, %s895_s13   ;;  %s693_s12 = sphi %s741_s12, %s894_s12  }
   0xa   : > { %p69_p0 = scmp.ne.s32.totalorder %s701_s14, %s697_s13  ;;  %p70_p1 = scmp.eq.s32.totalorder %s713_s17, 0 }
   0xb   : > { %p75_p2 = scmp.ne.s32.totalorder %s697_s13, %s693_s12  ;;  %p775_p3 = scmp.eq.s32.totalorder %s475_s18, 0 }
   0xc   : > { %p71_p4 = por %p70_p1, %p69_p0  ;;  %p477_p5 = scmp.ge.s32.totalorder %s713_s17, 1 }
   0xd   : > { %p782_p6 = por %p775_p3, %p75_p2  ;;  %p142_p7 = scmp.lt.s32.totalorder %s713_s17, 3 }
   0xe   : > { %p522_p9 = scmp.lt.s32.totalorder %s713_s17, 2  ;;  %s32_s24 = sadd.s32 1, %s709_s16 }
   0xf   : > { %p787_p8 = pnand %p477_p5, %p142_p7  ;;  %p34_p13 = scmp.ge.s32.totalorder %s32_s24, 2 }
  0x10   : > { %p794_p11 = pnand %p522_p9, %p71_p4  ;;  %s802_s25 = sand.u32 1, %s701_s14  }
  0x11   : > { %p510_p10 = pneg %p787_p8  ;;  %s715_s26 = smov [#allocation2]  }
  0x12   : > { %s893_s0 = sld [smem:[#allocation11_spill]]  ;;  %s900_s24 = smov (%p34_p13, %s32_s24), 0 }
  0x13   : > { %p511_p12 = pnand %p510_p10, %p775_p3  ;;  %s480_s29 = sshll.u32 %s802_s25, 3 }
  0x14   : > { %s498_s30 = sshll.u32 %s709_s16, 7  ;;  %s57_s4 = ssub.s32 %s709_s16, %s900_s24 }
  0x15   : > { %p60_p0 = scmp.eq.s32.totalorder %s57_s4, 0  ;;  %s176_s7 = scalar_lea.hbm %s885_s1, %s498_s30 }
  0x16   : > { %s168_s8 = scalar_lea.vmem [#allocation5], %s480_s29  ;;  %s165_s11 = scalar_lea.sflag [#allocation3], %s802_s25 }
  0x17   : > { %s177_s9 = sshll.u32 %s168_s8, 4  ;;  %p601_p1 = pneg %p794_p11  ;;  %s178_s9 = int_to_ptr.vmem [resolvable:$true] %s177_s9 }
  0x18   : > { %513 = dma.hbm_to_smem (!%p511_p12), %s893_s0, 16, %s715_s26, [#allocation4]  }
  0x19   : > { %s817_s10 = scalar_select %p60_p0, %s701_s14, %s62_s19  }
  0x1a   : > { %s612_s12 = scalar_lea.vmem %s178_s9, 128  ;;  %s716_s18 = smov [#allocation5]  }
  0x1b   : > { %p613_p2 = scmp.ne.s32.totalorder %s178_s9, %s612_s12  ;;  %s617_s26 = sshll.u32 %s716_s18, 4  ;;  %s618_s26 = int_to_ptr.vmem [resolvable:$false] %s617_s26 }
  0x1c   : > { %s619_s27 = scalar_lea.vmem %s618_s26, 256  ;;  %p620_p7 = scmp.lt.s32.totalorder %s178_s9, %s618_s26 }
  0x1d   : > { %p615_p4 = pnand %p613_p2, %p601_p1  ;;  %p621_p9 = scmp.lt.s32.totalorder %s619_s27, %s612_s12 }
  0x1f   : > { %p616_p5 = pneg %p615_p4  ;;  %p622_p10 = por %p621_p9, %p620_p7 }
  0x21   : > { %p623_p12 = pnand %p622_p10, %p616_p5 }
  0x23   : > { %626 = shalt.err (!%p623_p12)
}
  0x24   : > { %s717_s19 = smov 32   ;;  %s718_s28 = smov 2  }
  0x25   : > { %517 = dma.hbm_to_vmem [thread:$0]  (!%p794_p11), %s176_s7, 128, %s178_s9, %s165_s11, %s717_s19, %s717_s19, %s718_s28  }
  0x26   : > { %s483_s29 = sshll.u32 %s802_s25, 1  ;;  %s499_s30 = sshll.u32 %s709_s16, 5 }
  0x27   : > { %s199_s6 = scalar_lea.hbm %s886_s2, %s499_s30  ;;  %s191_s8 = scalar_lea.vmem [#allocation6], %s483_s29 }
  0x28   : > { %s201_s12 = sshll.u32 %s191_s8, 4  ;;  %s188_s18 = scalar_lea.sflag [#allocation7], %s802_s25  ;;  %s202_s12 = int_to_ptr.vmem [resolvable:$true] %s201_s12 }
  0x29   : > { %s640_s26 = scalar_lea.vmem %s202_s12, 32  ;;  %s719_s27 = smov [#allocation6]  }
  0x2a   : > { %p641_p13 = scmp.ne.s32.totalorder %s202_s12, %s640_s26  ;;  %s645_s0 = sshll.u32 %s719_s27, 4  ;;  %s646_s0 = int_to_ptr.vmem [resolvable:$false] %s645_s0 }
  0x2b   : > { %s647_s7 = scalar_lea.vmem %s646_s0, 64  ;;  %p648_p4 = scmp.lt.s32.totalorder %s202_s12, %s646_s0 }
  0x2c   : > { %p643_p0 = pnand %p641_p13, %p601_p1  ;;  %p649_p5 = scmp.lt.s32.totalorder %s647_s7, %s640_s26 }
  0x2e   : > { %p644_p2 = pneg %p643_p0  ;;  %p650_p7 = por %p649_p5, %p648_p4 }
  0x30   : > { %p651_p9 = pnand %p650_p7, %p644_p2 }
  0x32   : > { %654 = shalt.err (!%p651_p9)
}
  0x33   : > { %520 = dma.hbm_to_vmem [thread:$0]  (!%p794_p11), %s199_s6, 32, %s202_s12, %s188_s18  }
  0x34   : > { %210 = sbr.rel (%p787_p8) target bundleno = 342 (0x156), region = 32 }
  0x39   : > { %680 = dma.done.wait (%p775_p3), [#allocation4], 16  }
  0x3a   : > { %682 = vsyncadd (%p775_p3), [#allocation4], 4294967280  ;;  %s216_s25 = sand.u32 1, %s697_s13  }
  0x3b   : > { %s488_s0 = sshll.u32 %s216_s25, 3  ;;  %s217_s9 = scalar_lea.sflag [#allocation3], %s216_s25 }
  0x3c   : > { %s220_s11 = scalar_lea.vmem [#allocation5], %s488_s0 }
  0x3d   : > { %684 = dma.done.wait (%p782_p6), %s217_s9, 128  }
  0x3e   : > { %686 = vsyncadd (%p782_p6), %s217_s9, 4294967168  ;;  %s489_s22 = sshll.u32 %s216_s25, 1  ;;  %s226_s23 = scalar_lea.sflag [#allocation7], %s216_s25 }
  0x3f   : > { %s229_s19 = scalar_lea.vmem [#allocation6], %s489_s22 }
  0x40   : > { %688 = dma.done.wait (%p782_p6), %s226_s23, 32  }
  0x41   : > { %690 = vsyncadd (%p782_p6), %s226_s23, 4294967264 }
  0x42   : > { %234 = sfence }
  0x43   : > { %v266_v0 = vld [vmem:[%s220_s11] sm:$0x3]  ;;  %v490_v1 = vld [vmem:[%s220_s11 + $0x2] sm:$0x3]  ;;  %v491_v3 = vld [vmem:[%s220_s11 + $0x4] sm:$0x3]  ;;  %v331_v48 = vlaneseq }
  0x44   : > { %v269_v2 = vmax.f32 %v266_v0, %v490_v1  ;;  %v492_v4 = vld [vmem:[%s220_s11 + $0x6] sm:$0x3]  ;;  %v265_v15 = vld [vmem:[%s229_s19] sm:$0x3]  ;;  %v720_v21 = vmov 3.3333333e-06  }
  0x45   : > { %vm280_vm0 = vcmp.eq.s32.totalorder %v265_v15, 0  ;;  %vm291_vm1 = vcmp.eq.s32.totalorder %v265_v15, 1  ;;  %vm302_vm2 = vcmp.eq.s32.totalorder %v265_v15, 2  ;;  %vm313_vm3 = vcmp.eq.s32.totalorder %v265_v15, 3  ;;  %s284_s20 = sld [smem:[#allocation2]]  ;;  %p259_p3 = scmp.lt.s32.totalorder %s705_s15, 1 }
  0x46   : > { %v272_v5 = vmax.f32 %v269_v2, %v491_v3  ;;  %v281_v22 = vsel %vm280_vm0, 0.99999, %v720_v21  ;;  %v292_v23 = vsel %vm291_vm1, 0.99999, %v720_v21  ;;  %v303_v28 = vsel %vm302_vm2, 0.99999, %v720_v21 }
  0x47   : > { %v314_v31 = vsel %vm313_vm3, 0.99999, %v720_v21  ;;  %s493_s21 = sld [smem:[#allocation2 + $0x1]]  ;;  %v332_v50 = vshrl.u32 %v331_v48, 7  ;;  %vm341_vm4 = vcmask 1040384   ;;  %s902_s15 = smov (!%p259_p3, %s705_s15), 1 }
  0x48   : > { %v275_v6 = vmax.f32 %v272_v5, %v492_v4  ;;  %s494_s28 = sld [smem:[#allocation2 + $0x2]]  ;;  %s264_s5 = scalar_lea.vmem %s887_s3, %s902_s15  ;;  %vm355_vm5 = vcmask 0  }
  0x49   : > { %s495_s29 = sld [smem:[#allocation2 + $0x3]]  ;;  %v333_v54 = vsub.s32 0, %v332_v50  ;;  %v337_v55 = vsub.s32 1, %v332_v50 }
  0x4a   : > { %v276_v7 = vsub.f32 %v266_v0, %v275_v6  ;;  %v287_v8 = vsub.f32 %v490_v1, %v275_v6  ;;  %v298_v9 = vsub.f32 %v491_v3, %v275_v6  ;;  %v309_v10 = vsub.f32 %v492_v4, %v275_v6 }
  0x4b   : > { %v285_v35 = vstv %s284_s20 }
  0x4c   : > { %v277_v11 = vmul.f32 1.442695, %v276_v7  ;;  %v288_v12 = vmul.f32 1.442695, %v287_v8  ;;  %v299_v13 = vmul.f32 1.442695, %v298_v9 }
  0x4d   : > { %v310_v14 = vmul.f32 1.442695, %v309_v10  ;;  %v286_v37 = vsel %vm280_vm0, %v285_v35, 0.0  ;;  %v296_v38 = vstv %s493_s21 }
  0x4e   : > { %576 = vpow2.f32 %v277_v11  ;;  %v297_v41 = vsel %vm291_vm1, %v296_v38, %v286_v37  ;;  %v307_v42 = vstv %s494_s28 }
  0x4f   : > { %578 = vpow2.f32 %v288_v12  ;;  %v308_v44 = vsel %vm302_vm2, %v307_v42, %v297_v41  ;;  %v318_v45 = vstv %s495_s29 }
  0x50   : > { %580 = vpow2.f32 %v299_v13  ;;  %v319_v47 = vsel %vm313_vm3, %v318_v45, %v308_v44 }
  0x51   : > { %582 = vpow2.f32 %v310_v14 }
  0x5b   : > { %v577_v16 = vpop.eup %576 }
  0x5c   : > { %v579_v17 = vpop.eup %578  ;;  %v282_v25 = vmul.f32 %v577_v16, %v281_v22 }
  0x5d   : > { %v581_v18 = vpop.eup %580  ;;  %v290_v19 = vadd.f32 %v579_v17, %v577_v16  ;;  %v293_v26 = vmul.f32 %v579_v17, %v292_v23 }
  0x5e   : > { %v583_v20 = vpop.eup %582  ;;  %v304_v30 = vmul.f32 %v581_v18, %v303_v28 }
  0x5f   : > { %v301_v24 = vadd.f32 %v581_v18, %v290_v19  ;;  %v294_v29 = vadd.f32 %v293_v26, %v282_v25  ;;  %v315_v33 = vmul.f32 %v583_v20, %v314_v31 }
  0x61   : > { %v312_v27 = vadd.f32 %v583_v20, %v301_v24  ;;  %v305_v32 = vadd.f32 %v304_v30, %v294_v29 }
  0x63   : > { %584 = vrcp.f32 %v312_v27  ;;  %v316_v34 = vadd.f32 %v315_v33, %v305_v32 }
  0x70   : > { %v585_v36 = vpop.eup %584 }
  0x71   : > { %v321_v39 = vmul.f32 %v585_v36, %v316_v34 }
  0x73   : > { %v322_v40 = vadd.f32 1e-05, %v321_v39 }
  0x75   : > { %586 = vlog2.f32 %v322_v40  ;;  %v325_v43 = vsub.f32 1.0, %v322_v40 }
  0x77   : > { %v326_v46 = vmul.f32 %v325_v43, %v325_v43 }
  0x79   : > { %v327_v49 = vmul.f32 %v326_v46, %v319_v47 }
  0x7b   : > { %v328_v51 = vsub.f32 0.0, %v327_v49 }
  0x82   : > { %v587_v52 = vpop.eup %586 }
  0x83   : > { %v324_v53 = vmul.f32 0.6931472, %v587_v52 }
  0x85   : > { %v329_v56 = vmul.f32 %v328_v51, %v324_v53 }
  0x87   : > { %v334_v57 = vrot.slane %v329_v56, %v333_v54  ;;  %v338_v58 = vrot.slane %v329_v56, %v337_v55 }
  0x89   : > { %v342_v59 = vsel %vm341_vm4, %v334_v57, 0.0  ;;  %v343_v60 = vsel %vm341_vm4, %v338_v58, 0.0 }
  0x8a   : > { %v344_v61 = vadd.f32 %v343_v60, %v342_v59 }
  0x8c   : > { %345 = vadd.xlane.f32.xlu0 %v344_v61 }
 0x115   : > { %v346_v62 = vpop.xlane.xlu0 %345 }
 0x116   : > { %v347_v63 = vrot.slane %v346_v62, 4 }
 0x118   : > { %v348_v0 = vadd.f32 %v347_v63, %v346_v62 }
 0x11a   : > { %v349_v1 = vrot.slane %v348_v0, 2 }
 0x11c   : > { %v350_v2 = vadd.f32 %v349_v1, %v348_v0 }
 0x11e   : > { %v351_v3 = vrot.slane %v350_v2, 1 }
 0x120   : > { %v352_v4 = vadd.f32 %v351_v3, %v350_v2 }
 0x122   : > { %500 = vpush %v352_v4 }
 0x153   : > { %s501_s6 = spop %500 }
 0x154   : > { %v354_v5 = vstv %s501_s6 }
 0x155   : > { %356 = vst.msk [vmem:[%s264_s5] sm:$0x1] %vm355_vm5, %v354_v5 }
 0x156 PF: > { %s20_s17 = sadd.s32 1, %s713_s17   ;;  %s894_s12 = smov %s697_s13 }
 0x157   : > { %p17_p6 = scmp.ge.s32.totalorder %s20_s17, 4   ;;  %s895_s13 = smov %s701_s14 }
 0x158   : > { %s896_s14 = smov %s817_s10  ;;  %s897_s15 = smov %s709_s16 }
 0x159   : > { %s898_s16 = smov %s900_s24  ;;  %19 = sbr.rel (!%p17_p6) target bundleno = 9 (0x9), region = 93 }
 0x15e   :  { %380 = vsyncpa [#allocation3], 1 }
 0x15f   :  { %382 = vsyncpa [#allocation3 + $0x1], 1 }
 0x160   :  { %383 = vsyncpa [#allocation7], 1 }
 0x161   :  { %385 = vsyncpa [#allocation7 + $0x1], 1 }
 0x162   :  { %386 = vsyncpa [#allocation4], 1 }
 0x163   :  { %388 = vsyncpa [#allocation4 + $0x1], 1 }

</bundles_post_ra>
